<compile_context>
chip_gen: v7x
topology: tpu7x:2x2x1
jax: 0.10.0
libtpu: 0.0.40
codegen_flags: <defaults>
</compile_context>

<pallas_src>
import functools

import jax
import jax.numpy as jnp
from jax.experimental import pallas as pl
from jax.experimental.pallas import tpu as pltpu


def _label_smoothing_kernel(pred_ref, tgt_ref, out_ref, acc_ref, *, eps,
                            confidence, n_rows, row_tile, needs_mask):
    s = pl.program_id(0)              # split (core) index       -- "parallel"
    t = pl.program_id(1)              # row-tile index in split  -- "arbitrary"
    tiles_per_split = pl.num_programs(1)

    @pl.when(t == 0)
    def _():
        acc_ref[...] = jnp.zeros_like(acc_ref)

    x = pred_ref[...]
    if x.dtype != jnp.float32:        # only cast when input is not already f32
        x = x.astype(jnp.float32)
    c = x.shape[-1]

    # log_softmax pieces without materializing logp = x - m - lse:
    m = jnp.max(x, axis=-1, keepdims=True)                             # (TN,1)
    lse = jnp.log(jnp.sum(jnp.exp(x - m), axis=-1, keepdims=True))     # (TN,1)
    shift = m + lse
    sum_logp = jnp.sum(x, axis=-1, keepdims=True) - c * shift          # (TN,1)

    # gather x[row, target[row]] via iota/compare mask (directly from x)
    cols = jax.lax.broadcasted_iota(jnp.int32, x.shape, 1)
    tgt = tgt_ref[...]                                                 # (TN,1)
    x_t = jnp.sum(jnp.where(cols == tgt, x, 0.0), axis=-1, keepdims=True)
    logp_t = x_t - shift                                               # (TN,1)

    # sum(-true_dist * logp) per row; true_dist = eps everywhere except
    # confidence at the target index:
    row_loss = -eps * sum_logp - (confidence - eps) * logp_t           # (TN,1)

    if needs_mask:
        # Rows beyond N (partial last tile / duplicated clamped tiles) must
        # contribute exactly 0; jnp.where also squashes NaNs coming from the
        # undefined padding data of partial edge blocks.
        tile_idx = s * tiles_per_split + t
        row0 = tile_idx * row_tile
        rows = row0 + jax.lax.broadcasted_iota(jnp.int32, row_loss.shape, 0)
        row_loss = jnp.where(rows < n_rows, row_loss, 0.0)

    acc_ref[...] += row_loss

    @pl.when(t == tiles_per_split - 1)
    def _():
        partial = jnp.sum(acc_ref[...])
        # Lane-dense (8, 128) block store -> unmasked vst.
        out_ref[...] = jnp.broadcast_to(partial, out_ref.shape)


def _choose_row_tile(n, c, *, target_block_bytes=4 << 20, max_rows=16384,
                     vmem_cap_bytes=40 << 20):
    """Pick a row tile of ~target_block_bytes of pred, v7x-VMEM-safe."""
    bytes_per_row = 4 * max(c, 1)
    rt = target_block_bytes // bytes_per_row
    rt = min(rt, vmem_cap_bytes // (2 * bytes_per_row))  # double-buffer cap
    rt = min(rt, max_rows, n)
    rt = max(8, (rt // 8) * 8)                           # sublane multiple
    return int(rt)


def label_smoothing_loss(pred, target, *, num_classes, smoothing=0.0,
                         row_tile=None, num_splits=2):
    """pred: (N, C) float logits, target: (N,) int class ids -> scalar loss."""
    n, c = pred.shape
    assert c == num_classes
    # Matches the PyTorch module: fill = smoothing / (num_classes - 1)
    # (like the original, undefined for num_classes == 1).
    confidence = 1.0 - smoothing
    eps = smoothing / (num_classes - 1)

    if row_tile is None:
        row_tile = _choose_row_tile(n, c)
    n_tiles = int(pl.cdiv(n, row_tile))
    num_splits = max(1, min(num_splits, n_tiles))
    tiles_per_split = int(pl.cdiv(n_tiles, num_splits))
    # Masking only needed if the last tile is partial or clamped duplicate
    # trailing tiles exist (num_splits * tiles_per_split > n_tiles).
    needs_mask = (n % row_tile != 0) or (num_splits * tiles_per_split > n_tiles)

    tgt2d = target.astype(jnp.int32).reshape(n, 1)

    def row_block_map(s, t):
        # Clamp: num_splits * tiles_per_split may exceed n_tiles; duplicated
        # trailing tiles re-read the last valid block and are fully masked.
        return (jnp.minimum(s * tiles_per_split + t, n_tiles - 1), 0)

    kernel = functools.partial(
        _label_smoothing_kernel,
        eps=float(eps), confidence=float(confidence),
        n_rows=int(n), row_tile=int(row_tile), needs_mask=bool(needs_mask))

    pred_block_bytes = row_tile * c * 4
    vmem_limit = int(min(60 << 20,
                         max(16 << 20, 4 * pred_block_bytes + (8 << 20))))

    out = pl.pallas_call(
        kernel,
        out_shape=jax.ShapeDtypeStruct((num_splits * 8, 128), jnp.float32),
        grid_spec=pltpu.PrefetchScalarGridSpec(
            num_scalar_prefetch=0,
            grid=(num_splits, tiles_per_split),
            in_specs=[
                pl.BlockSpec((row_tile, c), row_block_map),
                pl.BlockSpec((row_tile, 1), row_block_map),
            ],
            out_specs=pl.BlockSpec((8, 128), lambda s, t: (s, 0)),
            scratch_shapes=[pltpu.VMEM((row_tile, 1), jnp.float32)],
        ),
        compiler_params=pltpu.CompilerParams(
            dimension_semantics=("parallel", "arbitrary"),
            vmem_limit_bytes=vmem_limit),
    )(pred, tgt2d)

    partials = out[0::8, 0]                 # one partial sum per split
    return jnp.sum(partials) / n


def _reference(pred, target, num_classes, smoothing):
    # Pure-JAX reference mirroring the PyTorch module.
    logp = jax.nn.log_softmax(pred, axis=-1)
    eps = smoothing / (num_classes - 1)
    confidence = 1.0 - smoothing
    true_dist = jnp.full_like(logp, eps)
    true_dist = true_dist.at[jnp.arange(pred.shape[0]), target].set(confidence)
    return jnp.mean(jnp.sum(-true_dist * logp, axis=-1))


if __name__ == "__main__":
    # N deliberately NOT a multiple of the row tile to exercise tail masking
    # and the 2-split (megacore) path.
    N, C = 37, 32
    smoothing = 0.1

    key = jax.random.PRNGKey(0)
    k_pred, k_tgt = jax.random.split(key)
    pred = jax.random.normal(k_pred, (N, C), dtype=jnp.float32)
    target = jax.random.randint(k_tgt, (N,), 0, C, dtype=jnp.int32)

    loss = label_smoothing_loss(pred, target, num_classes=C,
                                smoothing=smoothing)
    loss = jax.block_until_ready(loss)

    ref = _reference(pred, target, C, smoothing)
    assert jnp.allclose(loss, ref, rtol=1e-5, atol=1e-5), (loss, ref)

    print("KERNEL_OK")
</pallas_src>

<mosaic_0001>
module attributes {stable_mosaic.version = 11 : i64} {
  func.func @_label_smoothing_kernel(%arg0: i32, %arg1: i32, %arg2: memref<32x32xf32, #tpu.memory_space<vmem>>, %arg3: memref<32x1xi32, #tpu.memory_space<vmem>>, %arg4: memref<8x128xf32, #tpu.memory_space<vmem>>, %arg5: memref<32x1xf32, #tpu.memory_space<vmem>>) attributes {dimension_semantics = [#tpu.dimension_semantics<parallel>, #tpu.dimension_semantics<arbitrary>], iteration_bounds = array<i64: 2, 1>, scalar_prefetch = 0 : i64, scratch_operands = 1 : i64, tpu.core_type = #tpu.core_type<tc>, window_params = [{transform_indices = @transform_0, window_bounds = array<i64: 32, 32>}, {transform_indices = @transform_1, window_bounds = array<i64: 32, 1>}, {transform_indices = @transform_2, window_bounds = array<i64: 8, 128>}]} {
    %c0_i32 = arith.constant 0 : i32
    %0 = arith.cmpi eq, %arg1, %c0_i32 : i32
    %1 = arith.extui %0 : i1 to i32
    %c0_i32_0 = arith.constant 0 : i32
    %2 = arith.cmpi ne, %1, %c0_i32_0 : i32
    scf.if %2 {
      %cst_18 = arith.constant 0.000000e+00 : f32
      %48 = vector.broadcast %cst_18 : f32 to vector<32x1xf32>
      %c0_19 = arith.constant 0 : index
      %c0_20 = arith.constant 0 : index
      %49 = vector.load %arg5[%c0_19, %c0_20] : memref<32x1xf32, #tpu.memory_space<vmem>>, vector<32x1xf32>
      tpu.vector_store %arg5[%c0_19, %c0_20], %48 {strides = array<i32>} : memref<32x1xf32, #tpu.memory_space<vmem>>, vector<32x1xf32>,
    } else {
    }
    %c0 = arith.constant 0 : index
    %c0_1 = arith.constant 0 : index
    %3 = vector.load %arg2[%c0, %c0_1] : memref<32x32xf32, #tpu.memory_space<vmem>>, vector<32x32xf32>
    %cst = arith.constant dense<0xFF800000> : vector<32xf32>
    %4 = vector.multi_reduction <maximumf>, %3, %cst [1] : vector<32x32xf32> to vector<32xf32>
    %5 = vector.shape_cast %4 : vector<32xf32> to vector<32x1xf32>
    %6 = vector.broadcast %5 : vector<32x1xf32> to vector<32x32xf32>
    %7 = arith.subf %3, %6 : vector<32x32xf32>
    %8 = math.exp %7 : vector<32x32xf32>
    %cst_2 = arith.constant dense<0.000000e+00> : vector<32xf32>
    %9 = vector.multi_reduction <add>, %8, %cst_2 [1] : vector<32x32xf32> to vector<32xf32>
    %10 = vector.shape_cast %9 : vector<32xf32> to vector<32x1xf32>
    %11 = math.log %10 : vector<32x1xf32>
    %12 = arith.addf %5, %11 : vector<32x1xf32>
    %cst_3 = arith.constant dense<0.000000e+00> : vector<32xf32>
    %13 = vector.multi_reduction <add>, %3, %cst_3 [1] : vector<32x32xf32> to vector<32xf32>
    %14 = vector.shape_cast %13 : vector<32xf32> to vector<32x1xf32>
    %cst_4 = arith.constant 3.200000e+01 : f32
    %15 = vector.broadcast %cst_4 : f32 to vector<32x1xf32>
    %16 = arith.mulf %15, %12 : vector<32x1xf32>
    %17 = arith.subf %14, %16 : vector<32x1xf32>
    %18 = tpu.iota {dimensions = array<i32: 1>} : vector<32x32xi32>
    %c0_5 = arith.constant 0 : index
    %c0_6 = arith.constant 0 : index
    %19 = vector.load %arg3[%c0_5, %c0_6] : memref<32x1xi32, #tpu.memory_space<vmem>>, vector<32x1xi32>
    %20 = vector.broadcast %19 : vector<32x1xi32> to vector<32x32xi32>
    %21 = arith.cmpi eq, %18, %20 : vector<32x32xi32>
    %cst_7 = arith.constant 0.000000e+00 : f32
    %22 = vector.broadcast %cst_7 : f32 to vector<32x32xf32>
    %23 = arith.select %21, %3, %22 : vector<32x32xi1>, vector<32x32xf32>
    %cst_8 = arith.constant dense<0.000000e+00> : vector<32xf32>
    %24 = vector.multi_reduction <add>, %23, %cst_8 [1] : vector<32x32xf32> to vector<32xf32>
    %25 = vector.shape_cast %24 : vector<32xf32> to vector<32x1xf32>
    %26 = arith.subf %25, %12 : vector<32x1xf32>
    %cst_9 = arith.constant -0.0032258064 : f32
    %27 = vector.broadcast %cst_9 : f32 to vector<32x1xf32>
    %28 = arith.mulf %27, %17 : vector<32x1xf32>
    %cst_10 = arith.constant 0.896774172 : f32
    %29 = vector.broadcast %cst_10 : f32 to vector<32x1xf32>
    %30 = arith.mulf %29, %26 : vector<32x1xf32>
    %31 = arith.subf %28, %30 : vector<32x1xf32>
    %c1_i32 = arith.constant 1 : i32
    %32 = arith.muli %arg0, %c1_i32 : i32
    %33 = arith.addi %32, %arg1 : i32
    %c32_i32 = arith.constant 32 : i32
    %34 = arith.muli %33, %c32_i32 : i32
    %35 = tpu.iota {dimensions = array<i32: 0>} : vector<32x1xi32>
    %36 = vector.broadcast %34 : i32 to vector<32x1xi32>
    %37 = arith.addi %36, %35 : vector<32x1xi32>
    %c37_i32 = arith.constant 37 : i32
    %38 = vector.broadcast %c37_i32 : i32 to vector<32x1xi32>
    %39 = arith.cmpi slt, %37, %38 : vector<32x1xi32>
    %cst_11 = arith.constant 0.000000e+00 : f32
    %40 = vector.broadcast %cst_11 : f32 to vector<32x1xf32>
    %41 = arith.select %39, %31, %40 : vector<32x1xi1>, vector<32x1xf32>
    %c0_12 = arith.constant 0 : index
    %c0_13 = arith.constant 0 : index
    %42 = vector.load %arg5[%c0_12, %c0_13] : memref<32x1xf32, #tpu.memory_space<vmem>>, vector<32x1xf32>
    %43 = arith.addf %42, %41 : vector<32x1xf32>
    %c0_14 = arith.constant 0 : index
    %c0_15 = arith.constant 0 : index
    %44 = vector.load %arg5[%c0_14, %c0_15] : memref<32x1xf32, #tpu.memory_space<vmem>>, vector<32x1xf32>
    tpu.vector_store %arg5[%c0_14, %c0_15], %43 {strides = array<i32>} : memref<32x1xf32, #tpu.memory_space<vmem>>, vector<32x1xf32>,
    %c0_i32_16 = arith.constant 0 : i32
    %45 = arith.cmpi eq, %arg1, %c0_i32_16 : i32
    %46 = arith.extui %45 : i1 to i32
    %c0_i32_17 = arith.constant 0 : i32
    %47 = arith.cmpi ne, %46, %c0_i32_17 : i32
    scf.if %47 {
      %c0_18 = arith.constant 0 : index
      %c0_19 = arith.constant 0 : index
      %48 = vector.load %arg5[%c0_18, %c0_19] : memref<32x1xf32, #tpu.memory_space<vmem>>, vector<32x1xf32>
      %49 = vector.shape_cast %48 : vector<32x1xf32> to vector<1x32x1xf32>
      %cst_20 = arith.constant dense<0.000000e+00> : vector<1xf32>
      %50 = vector.multi_reduction <add>, %49, %cst_20 [1, 2] : vector<1x32x1xf32> to vector<1xf32>
      %51 = vector.shape_cast %50 : vector<1xf32> to vector<1x1x1xf32>
      %52 = vector.extract %51[0, 0, 0] : f32 from vector<1x1x1xf32>
      %53 = vector.broadcast %52 : f32 to vector<8x128xf32>
      %c0_21 = arith.constant 0 : index
      %c0_22 = arith.constant 0 : index
      %54 = vector.load %arg4[%c0_21, %c0_22] : memref<8x128xf32, #tpu.memory_space<vmem>>, vector<8x128xf32>
      tpu.vector_store %arg4[%c0_21, %c0_22], %53 {strides = array<i32>} : memref<8x128xf32, #tpu.memory_space<vmem>>, vector<8x128xf32>,
    } else {
    }
    return
  }
  func.func @transform_0(%arg0: i32, %arg1: i32) -> (i32, i32) {
    %c1_i32 = arith.constant 1 : i32
    %0 = arith.muli %arg0, %c1_i32 : i32
    %1 = arith.addi %0, %arg1 : i32
    %c1_i32_0 = arith.constant 1 : i32
    %2 = arith.minsi %1, %c1_i32_0 : i32
    %c0_i32 = arith.constant 0 : i32
    %c0_i32_1 = arith.constant 0 : i32
    return %2, %c0_i32 : i32, i32
  }
  func.func @transform_1(%arg0: i32, %arg1: i32) -> (i32, i32) {
    %c1_i32 = arith.constant 1 : i32
    %0 = arith.muli %arg0, %c1_i32 : i32
    %1 = arith.addi %0, %arg1 : i32
    %c1_i32_0 = arith.constant 1 : i32
    %2 = arith.minsi %1, %c1_i32_0 : i32
    %c0_i32 = arith.constant 0 : i32
    %c0_i32_1 = arith.constant 0 : i32
    return %2, %c0_i32 : i32, i32
  }
  func.func @transform_2(%arg0: i32, %arg1: i32) -> (i32, i32) {
    %c0_i32 = arith.constant 0 : i32
    %c0_i32_0 = arith.constant 0 : i32
    return %arg0, %c0_i32 : i32, i32
  }
}

</mosaic_0001>

<bundles_post_ra>
// kernel: tpu_custom_call.1
= control target key start
LH: loop header
LB: loop body
LE: loop exit
PB: predicated region body
PF: predicated region fallthrough
CT: control target
= control target key end

     0   :  { %7 = vsyncpa [#allocation4], 0  ;;  %s915_s0 = inlined_call_operand.vmem [shape: f32[37,32], index: 0, kind: input, shape index: {}]   ;;  %s916_s1 = inlined_call_operand.vmem [shape: s32[37,1], index: 1, kind: input, shape index: {}]   ;;  %s917_s2 = inlined_call_operand.hbm [shape: f32[16,128], index: 2, kind: output, shape index: {}]  }
   0x1   :  { %9 = vsyncpa [#allocation4 + $0x1], 0  ;;  %s737_s9 = smov 0   ;;  %s739_s10 = smov 0  }
   0x2   :  { %s741_s11 = smov 0   ;;  %s743_s12 = smov 0  }
   0x3   :  { %s745_s13 = smov 0   ;;  %s747_s14 = smov 0  }
   0x4 LB: > { %s547_s15 = sadd.s32 4294967295, %s717_s14   ;;  %s548_s16 = sadd.s32 4294967294, %s717_s14   ;;  %s717_s14 = sphi %s747_s14, %s15_s14   ;;  %s713_s13 = sphi %s745_s13, %s924_s13   ;;  %s709_s12 = sphi %s743_s12, %s923_s12   ;;  %s705_s11 = sphi %s741_s11, %s922_s11   ;;  %s701_s10 = sphi %s739_s10, %s921_s10   ;;  %s697_s9 = sphi %s737_s9, %s920_s9  }
   0x5   : > { %s27_s17 = sadd.s32 1, %s713_s13  ;;  %s98_s18 = sadd.s32 1, %s705_s11 }
   0x6   : > { %p29_p0 = scmp.ge.s32.totalorder %s27_s17, 2  ;;  %p108_p1 = scmp.ne.s32.totalorder %s705_s11, %s701_s10 }
   0x7   : > { %p109_p2 = scmp.eq.s32.totalorder %s547_s15, 1  ;;  %p114_p3 = scmp.ne.s32.totalorder %s701_s10, %s697_s9 }
   0x8   : > { %s926_s17 = smov (%p29_p0, %s27_s17), 0  ;;  %p115_p5 = scmp.eq.s32.totalorder %s548_s16, 1 }
   0x9   : > { %p777_p4 = por %p109_p2, %p108_p1  ;;  %s95_s20 = ssub.s32 %s713_s13, %s926_s17 }
   0xa   : > { %p551_p6 = scmp.ge.s32.totalorder %s717_s14, 1  ;;  %p96_p7 = scmp.eq.s32.totalorder %s95_s20, 0 }
   0xb   : > { %p784_p8 = por %p115_p5, %p114_p3  ;;  %p179_p9 = scmp.lt.s32.totalorder %s717_s14, 3 }
   0xc   : > { %s790_s22 = scalar_select %p96_p7, %s705_s11, %s98_s18  }
   0xd   : > { %p180_p10 = pnand %p551_p6, %p179_p9 }
   0xe   : > { %p221_p11 = scmp.lt.s32.totalorder (!%p180_p10), %s709_s12, 1  ;;  %v719_v0 = vmov (!%p180_p10), 0   ;;  %vm273_vm0 = vcmask (!%p180_p10), 261120   ;;  %v342_v25 = vlaneseq (!%p180_p10)  ;;  %vm264_vm5 = vcmask (!%p180_p10), 7168   ;;  %s557_s4 = sshll.u32 (!%p180_p10), %s709_s12, 5 }
   0xf   : > { %183 = sbr.rel (%p180_p10) target bundleno = 599 (0x257), region = 28  ;;  %622 = vset.pattern.permute.xlu1 (!%p180_p10), %v719_v0  ;;  %621 = vset.pattern.permute.xlu0 (!%p180_p10), %v719_v0  ;;  %v720_v51 = vmov (!%p180_p10), 0.0   ;;  %v403_v62 = vstv (!%p180_p10), %s557_s4  ;;  %s217_s5 = sand.u32 (!%p180_p10), 1, %s701_s10  }
  0x10   : > { %v343_v26 = vand.u32 (!%p180_p10), 127, %v342_v25  ;;  %265 = vst.msk [vmem:[#allocation2] sm:$0xff] (!%p180_p10), %vm264_vm5, %v720_v51  ;;  %266 = vst.msk [vmem:[#allocation2 + $0x8] sm:$0xff] (!%p180_p10), %vm264_vm5, %v720_v51  ;;  %v399_v59 = vshrl.u32 (!%p180_p10), %v342_v25, 7  ;;  %s552_s6 = sshll.u32 (!%p180_p10), %s217_s5, 3  ;;  %s559_s15 = sshll.u32 (!%p180_p10), %s709_s12, 7 }
  0x11   : > { %267 = vst.msk [vmem:[#allocation2 + $0x10] sm:$0xff] (!%p180_p10), %vm264_vm5, %v720_v51  ;;  %268 = vst.msk [vmem:[#allocation2 + $0x18] sm:$0xff] (!%p180_p10), %vm264_vm5, %v720_v51  ;;  %s219_s7 = scalar_lea.vmem (!%p180_p10), [#allocation3], %s552_s6 }
  0x12   : > { %s468_s8 = sshll.u32 (!%p180_p10), %s219_s7, 4  ;;  %s865_s8 = int_to_ptr.vmem [resolvable:$true] %s468_s8 }
  0x16   : > { %s222_s23 = scalar_select %p221_p11, %s709_s12, 1 }
  0x17   : > { %s721_s12 = smov [#allocation3]  }
  0x18   : > { %s553_s24 = sshll.u32 %s222_s23, 2  ;;  %s870_s23 = scalar_lea.hbm %s917_s2, %s559_s15 }
  0x19   : > { %p228_p12 = scmp.lt.s32.totalorder %s553_s24, 4  ;;  %s643_s26 = sshll.u32 %s721_s12, 4  ;;  %s644_s26 = int_to_ptr.vmem [resolvable:$false] %s643_s26 }
  0x1a   : > { %s645_s27 = scalar_lea.vmem %s644_s26, 256  ;;  %p646_p2 = scmp.lt.s32.totalorder %s865_s8, %s644_s26 }
  0x1b   : > { %s928_s24 = smov (!%p228_p12, %s553_s24), 4 }
  0x1c   : > { %s554_s25 = sshll.u32 %s928_s24, 3  ;;  %s455_s24 = scalar_lea.sflag [#allocation4], %s217_s5 }
  0x1d   : > { %s231_s28 = scalar_lea.vmem %s915_s0, %s554_s25  ;;  %s251_s3 = scalar_lea.vmem %s916_s1, %s554_s25 }
  0x1e   : > { %v269_v1 = vld [vmem:[%s231_s28] sm:$0xff]  ;;  %v797_v2 = vld [vmem:[%s231_s28 + $0x10] sm:$0xff]  ;;  %v799_v3 = vld [vmem:[%s231_s28 + $0x8] sm:$0xff]  ;;  %s639_s25 = scalar_lea.vmem %s865_s8, 128 }
  0x1f   : > { %v274_v4 = vsel %vm273_vm0, %v269_v1, -inf  ;;  %v280_v5 = vsel %vm273_vm0, %v797_v2, -inf  ;;  %v804_v6 = vld [vmem:[%s231_s28 + $0x18] sm:$0xff]  ;;  %v277_v7 = vsel %vm273_vm0, %v799_v3, -inf  ;;  %v345_v9 = vld [vmem:[%s251_s3 + $0x8] sm:$0xff]  ;;  %v346_v10 = vld [vmem:[%s251_s3 + $0x10] sm:$0xff]  ;;  %p640_p13 = scmp.ne.s32.totalorder %s865_s8, %s639_s25  ;;  %p647_p3 = scmp.lt.s32.totalorder %s645_s27, %s639_s25 }
  0x20   : > { %275 = vmax.xlane.f32.xlu0 %v274_v4  ;;  %281 = vmax.xlane.f32.xlu1 %v280_v5  ;;  %v283_v8 = vsel %vm273_vm0, %v804_v6, -inf  ;;  %v344_v11 = vld [vmem:[%s251_s3] sm:$0xff]  ;;  %v347_v12 = vld [vmem:[%s251_s3 + $0x18] sm:$0xff]  ;;  %v322_v39 = vsel %vm273_vm0, %v269_v1, 0.0  ;;  %v328_v40 = vsel %vm273_vm0, %v797_v2, 0.0  ;;  %v325_v42 = vsel %vm273_vm0, %v799_v3, 0.0 }
  0x21   : > { %v331_v43 = vsel %vm273_vm0, %v804_v6, 0.0  ;;  %p641_p0 = pnand %p640_p13, %p777_p4  ;;  %p648_p5 = por %p647_p3, %p646_p2 }
  0x23   : > { %p642_p1 = pneg %p641_p0 }
  0x24   : > { %278 = vmax.xlane.f32.xlu0 %v277_v7  ;;  %284 = vmax.xlane.f32.xlu1 %v283_v8  ;;  %v400_v8 = vadd.s32 8, %v399_v59 }
  0x25   : > { %p649_p6 = pnand %p648_p5, %p642_p1 }
  0x35   : > { %352 = vperm.xlu1 %622, %v345_v9  }
  0x39   : > { %355 = vperm.xlu1 %622, %v346_v10  }
  0x3a   : > { %349 = vperm.xlu0 %621, %v344_v11  }
  0x3d   : > { %358 = vperm.xlu1 %622, %v347_v12  }
  0xad   : > { %v813_v13 = vpop.xlane.xlu0 %275  ;;  %v815_v14 = vpop.xlane.xlu1 %281 }
  0xae   : > { %v286_v15 = vsub.f32 %v269_v1, %v813_v13  ;;  %v288_v16 = vsub.f32 %v797_v2, %v815_v14 }
  0xb0   : > { %v290_v17 = vmul.f32 1.442695, %v286_v15  ;;  %v294_v18 = vmul.f32 1.442695, %v288_v16 }
  0xb1   : > { %v820_v19 = vpop.xlane.xlu0 %278  ;;  %v822_v20 = vpop.xlane.xlu1 %284 }
  0xb2   : > { %623 = vpow2.f32 %v290_v17  ;;  %v287_v21 = vsub.f32 %v799_v3, %v820_v19  ;;  %v289_v22 = vsub.f32 %v804_v6, %v822_v20 }
  0xb3   : > { %625 = vpow2.f32 %v294_v18 }
  0xb4   : > { %v292_v23 = vmul.f32 1.442695, %v287_v21  ;;  %v296_v24 = vmul.f32 1.442695, %v289_v22  ;;  %v401_v21 = vadd.s32 16, %v399_v59 }
  0xb5   : > { %v353_v38 = vpop.permute.xlu1 %352 }
  0xb6   : > { %627 = vpow2.f32 %v292_v23  ;;  %vm361_vm2 = vcmp.eq.s32.totalorder %v343_v26, %v353_v38  ;;  %v417_v38 = vld [vmem:[#allocation2 + $0x8] sm:$0xff] }
  0xb7   : > { %629 = vpow2.f32 %v296_v24  ;;  %v365_v44 = vsel %vm361_vm2, %v799_v3, 0.0  ;;  %v416_v24 = vld [vmem:[#allocation2] sm:$0xff] }
  0xb8   : > { %v371_v45 = vsel %vm273_vm0, %v365_v44, 0.0 }
  0xb9   : > { %v350_v27 = vpop.permute.xlu0 %349  ;;  %v356_v41 = vpop.permute.xlu1 %355 }
  0xba   : > { %vm360_vm1 = vcmp.eq.s32.totalorder %v343_v26, %v350_v27  ;;  %vm362_vm3 = vcmp.eq.s32.totalorder %v343_v26, %v356_v41 }
  0xbb   : > { %v364_v33 = vsel %vm360_vm1, %v269_v1, 0.0  ;;  %v366_v47 = vsel %vm362_vm3, %v797_v2, 0.0 }
  0xbc   : > { %v624_v28 = vpop.eup %623  ;;  %v368_v37 = vsel %vm273_vm0, %v364_v33, 0.0  ;;  %v374_v48 = vsel %vm273_vm0, %v366_v47, 0.0 }
  0xbd   : > { %v626_v29 = vpop.eup %625  ;;  %v298_v30 = vsel %vm273_vm0, %v624_v28, 0.0  ;;  %v359_v46 = vpop.permute.xlu1 %358 }
  0xbe   : > { %299 = vadd.xlane.f32.xlu1 %v298_v30  ;;  %v304_v31 = vsel %vm273_vm0, %v626_v29, 0.0  ;;  %vm363_vm4 = vcmp.eq.s32.totalorder %v343_v26, %v359_v46  ;;  %v405_v26 = vadd.s32 %v403_v62, %v400_v8 }
  0xbf   : > { %v367_v49 = vsel %vm363_vm4, %v804_v6, 0.0  ;;  %v404_v6 = vadd.s32 %v403_v62, %v399_v59 }
  0xc0   : > { %v628_v32 = vpop.eup %627  ;;  %v377_v50 = vsel %vm273_vm0, %v367_v49, 0.0  ;;  %vm409_vm7 = vcmp.lt.s32.totalorder %v405_v26, 37 }
  0xc1   : > { %v630_v34 = vpop.eup %629  ;;  %v301_v35 = vsel %vm273_vm0, %v628_v32, 0.0  ;;  %vm408_vm6 = vcmp.lt.s32.totalorder %v404_v6, 37 }
  0xc2   : > { %305 = vadd.xlane.f32.xlu1 %v304_v31  ;;  %302 = vadd.xlane.f32.xlu0 %v301_v35  ;;  %v307_v36 = vsel %vm273_vm0, %v630_v34, 0.0  ;;  %v406_v31 = vadd.s32 %v403_v62, %v401_v21  ;;  %v402_v34 = vadd.s32 24, %v399_v59 }
  0xc4   : > { %vm410_vm8 = vcmp.lt.s32.totalorder %v406_v31, 37 }
  0xc6   : > { %308 = vadd.xlane.f32.xlu1 %v307_v36  ;;  %369 = vadd.xlane.f32.xlu0 %v368_v37 }
  0xca   : > { %323 = vadd.xlane.f32.xlu1 %v322_v39  ;;  %329 = vadd.xlane.f32.xlu0 %v328_v40 }
  0xce   : > { %326 = vadd.xlane.f32.xlu1 %v325_v42  ;;  %332 = vadd.xlane.f32.xlu0 %v331_v43  ;;  %v407_v42 = vadd.s32 %v403_v62, %v402_v34 }
  0xd0   : > { %vm411_vm9 = vcmp.lt.s32.totalorder %v407_v42, 37 }
  0xd2   : > { %372 = vadd.xlane.f32.xlu1 %v371_v45  ;;  %v418_v45 = vld [vmem:[#allocation2 + $0x10] sm:$0xff] }
  0xd6   : > { %375 = vadd.xlane.f32.xlu1 %v374_v48 }
  0xda   : > { %378 = vadd.xlane.f32.xlu1 %v377_v50 }
 0x14b   : > { %v300_v52 = vpop.xlane.xlu1 %299 }
 0x14c   : > { %631 = vlog2.f32 %v300_v52 }
 0x14f   : > { %v306_v53 = vpop.xlane.xlu1 %305  ;;  %v303_v54 = vpop.xlane.xlu0 %302 }
 0x150   : > { %633 = vlog2.f32 %v306_v53  ;;  %v419_v53 = vld [vmem:[#allocation2 + $0x18] sm:$0xff] }
 0x151   : > { %635 = vlog2.f32 %v303_v54 }
 0x153   : > { %v309_v55 = vpop.xlane.xlu1 %308  ;;  %v370_v60 = vpop.xlane.xlu0 %369 }
 0x154   : > { %637 = vlog2.f32 %v309_v55 }
 0x156   : > { %v632_v56 = vpop.eup %631 }
 0x157   : > { %v311_v57 = vmul.f32 0.6931472, %v632_v56  ;;  %v324_v58 = vpop.xlane.xlu1 %323  ;;  %v330_v10 = vpop.xlane.xlu0 %329 }
 0x159   : > { %v318_v61 = vadd.f32 %v311_v57, %v813_v13 }
 0x15a   : > { %v634_v63 = vpop.eup %633 }
 0x15b   : > { %v636_v0 = vpop.eup %635  ;;  %v315_v1 = vmul.f32 0.6931472, %v634_v63  ;;  %v334_v2 = vmul.f32 32.0, %v318_v61  ;;  %v380_v3 = vsub.f32 %v370_v60, %v318_v61  ;;  %v327_v4 = vpop.xlane.xlu1 %326 }
 0x15c   : > { %v313_v5 = vmul.f32 0.6931472, %v636_v0  ;;  %v333_v33 = vpop.xlane.xlu0 %332 }
 0x15d   : > { %v338_v7 = vsub.f32 %v324_v58, %v334_v2  ;;  %v320_v9 = vadd.f32 %v315_v1, %v815_v14  ;;  %v388_v12 = vmul.f32 0.8967742, %v380_v3 }
 0x15e   : > { %v638_v11 = vpop.eup %637  ;;  %v319_v15 = vadd.f32 %v313_v5, %v820_v19 }
 0x15f   : > { %v317_v16 = vmul.f32 0.6931472, %v638_v11  ;;  %v384_v13 = vmul.f32 -0.0032258064, %v338_v7  ;;  %v373_v17 = vpop.xlane.xlu1 %372  ;;  %v336_v18 = vmul.f32 32.0, %v320_v9 }
 0x160   : > { %v335_v22 = vmul.f32 32.0, %v319_v15  ;;  %v381_v23 = vsub.f32 %v373_v17, %v319_v15 }
 0x161   : > { %v392_v25 = vsub.f32 %v384_v13, %v388_v12  ;;  %v321_v27 = vadd.f32 %v317_v16, %v822_v20  ;;  %v340_v29 = vsub.f32 %v330_v10, %v336_v18 }
 0x162   : > { %v339_v28 = vsub.f32 %v327_v4, %v335_v22  ;;  %v389_v14 = vmul.f32 0.8967742, %v381_v23 }
 0x163   : > { %v412_v30 = vsel %vm408_vm6, %v392_v25, 0.0  ;;  %v376_v32 = vpop.xlane.xlu1 %375  ;;  %v337_v19 = vmul.f32 32.0, %v321_v27  ;;  %v386_v40 = vmul.f32 -0.0032258064, %v340_v29 }
 0x164   : > { %v420_v35 = vadd.f32 %v416_v24, %v412_v30  ;;  %v385_v36 = vmul.f32 -0.0032258064, %v339_v28  ;;  %v382_v37 = vsub.f32 %v376_v32, %v320_v9 }
 0x165   : > { %v341_v20 = vsub.f32 %v333_v33, %v337_v19 }
 0x166   : > { %425 = vst.msk [vmem:[#allocation2] sm:$0xff] %vm264_vm5, %v420_v35  ;;  %v393_v39 = vsub.f32 %v385_v36, %v389_v14  ;;  %v390_v41 = vmul.f32 0.8967742, %v382_v37 }
 0x167   : > { %v379_v43 = vpop.xlane.xlu1 %378  ;;  %v387_v50 = vmul.f32 -0.0032258064, %v341_v20 }
 0x168   : > { %v413_v44 = vsel %vm409_vm7, %v393_v39, 0.0  ;;  %v394_v46 = vsub.f32 %v386_v40, %v390_v41  ;;  %v383_v47 = vsub.f32 %v379_v43, %v321_v27 }
 0x169   : > { %v421_v48 = vadd.f32 %v417_v38, %v413_v44 }
 0x16a   : > { %v414_v49 = vsel %vm410_vm8, %v394_v46, 0.0  ;;  %v391_v51 = vmul.f32 0.8967742, %v383_v47 }
 0x16b   : > { %426 = vst.msk [vmem:[#allocation2 + $0x8] sm:$0xff] %vm264_vm5, %v421_v48  ;;  %v422_v52 = vadd.f32 %v418_v45, %v414_v49 }
 0x16c   : > { %v395_v54 = vsub.f32 %v387_v50, %v391_v51 }
 0x16d   : > { %427 = vst.msk [vmem:[#allocation2 + $0x10] sm:$0xff] %vm264_vm5, %v422_v52  ;;  %v432_v57 = vld [vmem:[#allocation2] sm:$0xff] }
 0x16e   : > { %v415_v55 = vsel %vm411_vm9, %v395_v54, 0.0  ;;  %v436_v59 = vsel %vm264_vm5, %v432_v57, 0.0 }
 0x16f   : > { %v423_v56 = vadd.f32 %v419_v53, %v415_v55 }
 0x171   : > { %428 = vst.msk [vmem:[#allocation2 + $0x18] sm:$0xff] %vm264_vm5, %v423_v56 }
 0x172   : > { %v433_v58 = vld [vmem:[#allocation2 + $0x8] sm:$0xff] }
 0x173   : > { %v437_v60 = vsel %vm264_vm5, %v433_v58, 0.0 }
 0x174   : > { %v434_v61 = vld [vmem:[#allocation2 + $0x10] sm:$0xff]  ;;  %v438_v62 = vadd.f32 %v437_v60, %v436_v59 }
 0x175   : > { %v439_v63 = vsel %vm264_vm5, %v434_v61, 0.0 }
 0x176   : > { %v440_v1 = vadd.f32 %v439_v63, %v438_v62 }
 0x178   : > { %v435_v0 = vld [vmem:[#allocation2 + $0x18] sm:$0xff] }
 0x179   : > { %v441_v2 = vsel %vm264_vm5, %v435_v0, 0.0 }
 0x17a   : > { %v442_v3 = vadd.f32 %v441_v2, %v440_v1 }
 0x17c   : > { %443 = vadd.xlane.f32.xlu0 %v442_v3 }
 0x209   : > { %v444_v4 = vpop.xlane.xlu0 %443 }
 0x20a   : > { %v445_v5 = vrot.slane %v444_v4, 4 }
 0x20c   : > { %v446_v6 = vadd.f32 %v445_v5, %v444_v4 }
 0x20e   : > { %v447_v7 = vrot.slane %v446_v6, 2 }
 0x210   : > { %v448_v8 = vadd.f32 %v447_v7, %v446_v6 }
 0x212   : > { %v449_v9 = vrot.slane %v448_v8, 1 }
 0x214   : > { %v450_v10 = vadd.f32 %v449_v9, %v448_v8 }
 0x216   : > { %562 = vpush %v450_v10 }
 0x247   : > { %s563_s16 = spop %562 }
 0x248   : > { %v452_v11 = vstv %s563_s16 }
 0x249   : > { %453 = vst [vmem:[%s219_s7] sm:$0xff] %v452_v11 }
 0x24a   : > { %652 = shalt.err (!%p649_p6)
}
 0x24b   : > { %s653_s28 = scalar_lea.hbm %s870_s23, 128  ;;  %s657_s3 = scalar_lea.hbm %s917_s2, 256 }
 0x24c   : > { %p654_p7 = scmp.ne.s32.totalorder %s870_s23, %s653_s28  ;;  %p658_p11 = scmp.lt.u32.totalorder %s870_s23, %s917_s2 }
 0x24d   : > { %p659_p12 = scmp.lt.u32.totalorder %s657_s3, %s653_s28  ;;  %p661_p0 = scmp.lt.u32.totalorder %s653_s28, %s870_s23 }
 0x24e   : > { %p655_p9 = pnand %p654_p7, %p777_p4 }
 0x24f   : > { %p660_p13 = por %p659_p12, %p658_p11 }
 0x250   : > { %p656_p10 = pneg %p655_p9 }
 0x251   : > { %p662_p1 = por %p661_p0, %p660_p13 }
 0x253   : > { %p663_p2 = pnand %p662_p1, %p656_p10 }
 0x255   : > { %666 = shalt.err (!%p663_p2)
}
 0x256   : > { %564 = dma.vmem_to_hbm [thread:$0]  (%p777_p4), %s865_s8, 128, %s870_s23, %s455_s24  }
 0x257 PF: > { %p570_p3 = scmp.ge.s32.totalorder %s717_s14, 2  ;;  %s480_s6 = sand.u32 1, %s697_s9  }
 0x258   : > { %s481_s7 = scalar_lea.sflag [#allocation4], %s480_s6 }
 0x259   : > { %p567_p5 = pnand %p570_p3, %p784_p8 }
 0x25b   : > { %692 = dma.done.wait (!%p567_p5), %s481_s7, 128  }
 0x25c   : > { %694 = vsyncadd (!%p567_p5), %s481_s7, 4294967168  ;;  %s15_s14 = sadd.s32 1, %s717_s14   ;;  %s920_s9 = smov %s701_s10 }
 0x25d   : > { %p12_p6 = scmp.ge.s32.totalorder %s15_s14, 4   ;;  %s921_s10 = smov %s705_s11 }
 0x25e   : > { %s922_s11 = smov %s790_s22  ;;  %s923_s12 = smov %s713_s13 }
 0x25f   : > { %s924_s13 = smov %s926_s17  ;;  %14 = sbr.rel (!%p12_p6) target bundleno = 4 (0x4), region = 74 }
 0x266   :  { %486 = vsyncpa [#allocation4], 1 }
 0x267   :  { %488 = vsyncpa [#allocation4 + $0x1], 1 }

</bundles_post_ra>
